<compile_context>
chip_gen: v7x
topology: tpu7x:2x2x1
jax: 0.10.0
libtpu: 0.0.40
codegen_flags: <defaults>
</compile_context>

<pallas_src>
import functools

import jax
import jax.numpy as jnp
from jax.experimental import pallas as pl
from jax.experimental.pallas import tpu as pltpu

_SUBLANE = 8
_TILE_BYTES_TARGET = 4 * 1024 * 1024   # per (TK, C) input buffer (x2 for double-buffering)


def _round_up(x, m):
    return ((x + m - 1) // m) * m


def _choose_hw_tiling(hw, c, itemsize):
    """Pick TK (multiple of 8) along HW and the zero-padded HW extent."""
    tk = max(_SUBLANE, (_TILE_BYTES_TARGET // (itemsize * c)) // _SUBLANE * _SUBLANE)
    hw8 = _round_up(hw, _SUBLANE)
    if tk >= hw8:                     # whole spatial extent fits in one tile
        return hw8, hw8, 1
    nk = -(-hw // tk)
    return tk, nk * tk, nk


def _to_hwc(feat, hw_pad):
    """(B, C, H, W) -> zero-padded (B, hw_pad, C). Zero rows do not change A^T A."""
    B, C, H, W = feat.shape
    x = feat.reshape(B, C, H * W).swapaxes(1, 2)          # (B, HW, C)
    if hw_pad != H * W:
        x = jnp.pad(x, ((0, 0), (0, hw_pad - H * W), (0, 0)))
    return x


# ----------------------------------------------------------------------------
# Kernel 1: normalized Gram matrix (used to precompute target grams in __init__)
# ----------------------------------------------------------------------------
def _gram_kernel(x_ref, g_ref, acc_ref, *, inv_n):
    k = pl.program_id(1)

    @pl.when(k == 0)
    def _init():
        acc_ref[...] = jnp.zeros_like(acc_ref)

    x = x_ref[...].astype(jnp.float32)                    # (TK, C): HW on sublanes, C on lanes
    acc_ref[...] += jax.lax.dot_general(                  # A^T A -> (C, C)
        x, x, (((0,), (0,)), ((), ())), preferred_element_type=jnp.float32)

    @pl.when(k == pl.num_programs(1) - 1)
    def _finalize():
        g_ref[...] = (acc_ref[...] * inv_n).astype(g_ref.dtype)


def gram_matrix(feat):
    """feat: (B, C, H, W) -> (B, C, C) normalized Gram matrix (float32)."""
    B, C, H, W = feat.shape
    hw = H * W
    tk, hw_pad, nk = _choose_hw_tiling(hw, C, jnp.dtype(feat.dtype).itemsize)
    x = _to_hwc(feat, hw_pad)
    inv_n = 1.0 / float(C * hw)

    return pl.pallas_call(
        functools.partial(_gram_kernel, inv_n=inv_n),
        out_shape=jax.ShapeDtypeStruct((B, C, C), jnp.float32),
        grid=(B, nk),
        in_specs=[pl.BlockSpec((None, tk, C), lambda b, k: (b, k, 0))],
        out_specs=pl.BlockSpec((None, C, C), lambda b, k: (b, 0, 0)),
        scratch_shapes=[pltpu.VMEM((C, C), jnp.float32)],
        compiler_params=pltpu.CompilerParams(
            dimension_semantics=("parallel", "arbitrary")),
        cost_estimate=pl.CostEstimate(
            flops=2 * B * C * C * hw,
            transcendentals=0,
            bytes_accessed=B * (hw_pad * C * x.dtype.itemsize + C * C * 4)),
    )(x)


# ----------------------------------------------------------------------------
# Kernel 2: per-layer style loss; emits per-batch partial sums, summed in JAX
# ----------------------------------------------------------------------------
def _style_layer_loss_kernel(x_ref, t_ref, o_ref, acc_ref, *, inv_n):
    k = pl.program_id(1)

    @pl.when(k == 0)
    def _init():
        acc_ref[...] = jnp.zeros_like(acc_ref)

    x = x_ref[...].astype(jnp.float32)                    # (TK, C)
    acc_ref[...] += jax.lax.dot_general(                  # accumulate Gram over HW tiles
        x, x, (((0,), (0,)), ((), ())), preferred_element_type=jnp.float32)

    @pl.when(k == pl.num_programs(1) - 1)
    def _finalize():
        d = acc_ref[...] * inv_n - t_ref[...]
        o_ref[...] = jnp.sum(d * d, keepdims=True)        # (1, 1)


def style_layer_loss(pred, target_gram):
    """pred: (B, C, H, W); target_gram: (B, C, C) -> scalar (unweighted) loss."""
    B, C, H, W = pred.shape
    hw = H * W
    tk, hw_pad, nk = _choose_hw_tiling(hw, C, jnp.dtype(pred.dtype).itemsize)
    x = _to_hwc(pred, hw_pad)
    inv_n = 1.0 / float(C * hw)

    partials = pl.pallas_call(
        functools.partial(_style_layer_loss_kernel, inv_n=inv_n),
        out_shape=jax.ShapeDtypeStruct((B, 1, 1), jnp.float32),
        grid=(B, nk),
        in_specs=[
            pl.BlockSpec((None, tk, C), lambda b, k: (b, k, 0)),
            pl.BlockSpec((None, C, C), lambda b, k: (b, 0, 0)),
        ],
        out_specs=pl.BlockSpec((None, 1, 1), lambda b, k: (b, 0, 0)),
        scratch_shapes=[pltpu.VMEM((C, C), jnp.float32)],
        compiler_params=pltpu.CompilerParams(
            dimension_semantics=("parallel", "arbitrary")),
        cost_estimate=pl.CostEstimate(
            flops=2 * B * C * C * hw,
            transcendentals=0,
            bytes_accessed=B * (hw_pad * C * x.dtype.itemsize + 2 * C * C * 4)),
    )(x, target_gram)
    return jnp.sum(partials)


# ----------------------------------------------------------------------------
# Module equivalent of StyleLoss_Gram
# ----------------------------------------------------------------------------
class StyleLossGram:
    def __init__(self, targets, weights=None):
        # Precompute target Gram matrices (as in the PyTorch __init__).
        self.targets = [gram_matrix(t) for t in targets]
        self.weights = [1.0] * len(targets) if weights is None else weights

    def __call__(self, preds):
        loss = jnp.float32(0.0)
        for p, t, w in zip(preds, self.targets, self.weights):
            loss = loss + style_layer_loss(p, t) * jnp.float32(w)
        return loss * jnp.float32(0.25)


# ----------------------------------------------------------------------------
# Pure-JAX reference for verification
# ----------------------------------------------------------------------------
def _gram_ref(x):
    B, C, H, W = x.shape
    xf = x.reshape(B, C, H * W).astype(jnp.float32)
    return (xf @ jnp.swapaxes(xf, -1, -2)) / (C * H * W)


def _ref_loss(preds, targets, weights):
    loss = jnp.float32(0.0)
    for p, t, w in zip(preds, targets, weights):
        loss = loss + jnp.sum((_gram_ref(p) - _gram_ref(t)) ** 2) * w
    return 0.25 * loss


if __name__ == "__main__":
    key = jax.random.PRNGKey(0)
    k1, k2, k3, k4 = jax.random.split(key, 4)

    # Two "style layers" with different channel / spatial sizes.
    targets = [
        jax.random.normal(k1, (2, 4, 16, 16), jnp.float32),
        jax.random.normal(k2, (2, 8, 8, 8), jnp.float32),
    ]
    preds = [
        jax.random.normal(k3, (2, 4, 16, 16), jnp.float32),
        jax.random.normal(k4, (2, 8, 8, 8), jnp.float32),
    ]
    weights = [1.0, 0.5]

    module = StyleLossGram(targets, weights)
    loss = jax.block_until_ready(module(preds))

    ref = jax.block_until_ready(_ref_loss(preds, targets, weights))
    assert jnp.allclose(loss, ref, rtol=1e-4, atol=1e-4), (loss, ref)

    print("KERNEL_OK")
</pallas_src>

<mosaic_0001>
module attributes {stable_mosaic.version = 11 : i64} {
  func.func @_gram_kernel(%arg0: i32, %arg1: i32, %arg2: memref<1x256x4xf32, #tpu.memory_space<vmem>>, %arg3: memref<1x4x4xf32, #tpu.memory_space<vmem>>, %arg4: memref<4x4xf32, #tpu.memory_space<vmem>>) attributes {dimension_semantics = [#tpu.dimension_semantics<parallel>, #tpu.dimension_semantics<arbitrary>], iteration_bounds = array<i64: 2, 1>, scalar_prefetch = 0 : i64, scratch_operands = 1 : i64, tpu.core_type = #tpu.core_type<tc>, window_params = [{transform_indices = @transform_0, window_bounds = array<i64: 1, 256, 4>}, {transform_indices = @transform_1, window_bounds = array<i64: 1, 4, 4>}]} {
    %c0_i32 = arith.constant 0 : i32
    %0 = arith.cmpi eq, %arg1, %c0_i32 : i32
    %1 = arith.extui %0 : i1 to i32
    %c0_i32_0 = arith.constant 0 : i32
    %2 = arith.cmpi ne, %1, %c0_i32_0 : i32
    scf.if %2 {
      %cst_9 = arith.constant 0.000000e+00 : f32
      %12 = vector.broadcast %cst_9 : f32 to vector<4x4xf32>
      %c0_10 = arith.constant 0 : index
      %c0_11 = arith.constant 0 : index
      %13 = vector.load %arg4[%c0_10, %c0_11] : memref<4x4xf32, #tpu.memory_space<vmem>>, vector<4x4xf32>
      tpu.vector_store %arg4[%c0_10, %c0_11], %12 {strides = array<i32>} : memref<4x4xf32, #tpu.memory_space<vmem>>, vector<4x4xf32>,
    } else {
    }
    %c0 = arith.constant 0 : index
    %c0_1 = arith.constant 0 : index
    %c0_2 = arith.constant 0 : index
    %3 = vector.load %arg2[%c0, %c0_1, %c0_2] : memref<1x256x4xf32, #tpu.memory_space<vmem>>, vector<1x256x4xf32>
    %4 = vector.shape_cast %3 : vector<1x256x4xf32> to vector<256x4xf32>
    %c0_3 = arith.constant 0 : index
    %c0_4 = arith.constant 0 : index
    %5 = vector.load %arg4[%c0_3, %c0_4] : memref<4x4xf32, #tpu.memory_space<vmem>>, vector<4x4xf32>
    %cst = arith.constant dense<0.000000e+00> : vector<4x4xf32>
    %6 = tpu.matmul %4, %4, %cst {dimension_numbers = #tpu.dot_dimension_numbers<[0], [0], [1], [1], [0, 1, 1, 1], [], []>} : vector<256x4xf32>, vector<256x4xf32>, vector<4x4xf32> -> vector<4x4xf32>
    %7 = arith.addf %5, %6 : vector<4x4xf32>
    %c0_5 = arith.constant 0 : index
    %c0_6 = arith.constant 0 : index
    %8 = vector.load %arg4[%c0_5, %c0_6] : memref<4x4xf32, #tpu.memory_space<vmem>>, vector<4x4xf32>
    tpu.vector_store %arg4[%c0_5, %c0_6], %7 {strides = array<i32>} : memref<4x4xf32, #tpu.memory_space<vmem>>, vector<4x4xf32>,
    %c0_i32_7 = arith.constant 0 : i32
    %9 = arith.cmpi eq, %arg1, %c0_i32_7 : i32
    %10 = arith.extui %9 : i1 to i32
    %c0_i32_8 = arith.constant 0 : i32
    %11 = arith.cmpi ne, %10, %c0_i32_8 : i32
    scf.if %11 {
      %c0_9 = arith.constant 0 : index
      %c0_10 = arith.constant 0 : index
      %12 = vector.load %arg4[%c0_9, %c0_10] : memref<4x4xf32, #tpu.memory_space<vmem>>, vector<4x4xf32>
      %cst_11 = arith.constant 9.765625E-4 : f32
      %13 = vector.broadcast %cst_11 : f32 to vector<4x4xf32>
      %14 = arith.mulf %12, %13 : vector<4x4xf32>
      %c0_12 = arith.constant 0 : index
      %c0_13 = arith.constant 0 : index
      %c0_14 = arith.constant 0 : index
      %15 = vector.load %arg3[%c0_12, %c0_13, %c0_14] : memref<1x4x4xf32, #tpu.memory_space<vmem>>, vector<1x4x4xf32>
      %16 = vector.shape_cast %15 : vector<1x4x4xf32> to vector<4x4xf32>
      %17 = vector.shape_cast %14 : vector<4x4xf32> to vector<1x4x4xf32>
      tpu.vector_store %arg3[%c0_12, %c0_13, %c0_14], %17 {strides = array<i32>} : memref<1x4x4xf32, #tpu.memory_space<vmem>>, vector<1x4x4xf32>,
    } else {
    }
    return
  }
  func.func @transform_0(%arg0: i32, %arg1: i32) -> (i32, i32, i32) {
    %c0_i32 = arith.constant 0 : i32
    %c0_i32_0 = arith.constant 0 : i32
    return %arg0, %arg1, %c0_i32 : i32, i32, i32
  }
  func.func @transform_1(%arg0: i32, %arg1: i32) -> (i32, i32, i32) {
    %c0_i32 = arith.constant 0 : i32
    %c0_i32_0 = arith.constant 0 : i32
    %c0_i32_1 = arith.constant 0 : i32
    return %arg0, %c0_i32, %c0_i32_0 : i32, i32, i32
  }
}

</mosaic_0001>

<bundles_post_ra>
// kernel: tpu_custom_call.1
= control target key start
LH: loop header
LB: loop body
LE: loop exit
PB: predicated region body
PF: predicated region fallthrough
CT: control target
= control target key end

     0   :  { %6 = vsyncpa [#allocation4], 0  ;;  %s826_s0 = inlined_call_operand.vmem [shape: f32[2,256,4], index: 0, kind: input, shape index: {}]   ;;  %s827_s1 = inlined_call_operand.hbm [shape: f32[2,4,4], index: 1, kind: output, shape index: {}]  }
   0x1   :  { %8 = vsyncpa [#allocation4 + $0x1], 0  ;;  %s677_s6 = smov 0   ;;  %s679_s7 = smov 0  }
   0x2   :  { %s681_s8 = smov 0   ;;  %s683_s9 = smov 0  }
   0x3   :  { %s685_s10 = smov 0   ;;  %s687_s11 = smov 0  }
   0x4 LB: > { %s412_s12 = sadd.s32 4294967295, %s663_s11   ;;  %s413_s13 = sadd.s32 4294967294, %s663_s11   ;;  %s663_s11 = sphi %s687_s11, %s14_s11   ;;  %s659_s10 = sphi %s685_s10, %s834_s10   ;;  %s655_s9 = sphi %s683_s9, %s833_s9   ;;  %s651_s8 = sphi %s681_s8, %s832_s8   ;;  %s647_s7 = sphi %s679_s7, %s831_s7   ;;  %s643_s6 = sphi %s677_s6, %s830_s6  }
   0x5   : > { %s26_s14 = sadd.s32 1, %s659_s10  ;;  %s61_s15 = sadd.s32 1, %s651_s8 }
   0x6   : > { %p28_p0 = scmp.ge.s32.totalorder %s26_s14, 2  ;;  %p71_p1 = scmp.ne.s32.totalorder %s651_s8, %s647_s7 }
   0x7   : > { %p72_p2 = scmp.eq.s32.totalorder %s412_s12, 1  ;;  %p77_p3 = scmp.ne.s32.totalorder %s647_s7, %s643_s6 }
   0x8   : > { %s836_s14 = smov (%p28_p0, %s26_s14), 0  ;;  %p78_p5 = scmp.eq.s32.totalorder %s413_s13, 1 }
   0x9   : > { %p717_p4 = por %p72_p2, %p71_p1  ;;  %s58_s17 = ssub.s32 %s659_s10, %s836_s14 }
   0xa   : > { %p416_p6 = scmp.ge.s32.totalorder %s663_s11, 1  ;;  %p59_p7 = scmp.eq.s32.totalorder %s58_s17, 0 }
   0xb   : > { %p724_p8 = por %p78_p5, %p77_p3  ;;  %p109_p9 = scmp.lt.s32.totalorder %s663_s11, 3 }
   0xc   : > { %s730_s19 = scalar_select %p59_p7, %s651_s8, %s61_s15  }
   0xd   : > { %p110_p10 = pnand %p416_p6, %p109_p9 }
   0xe   : > { %p134_p11 = scmp.lt.s32.totalorder (!%p110_p10), %s655_s9, 1  ;;  %vm147_vm0 = vcmask (!%p110_p10), 27648   ;;  %s130_s25 = sand.u32 (!%p110_p10), 1, %s647_s7  }
   0xf   : > { %113 = sbr.rel (%p110_p10) target bundleno = 403 (0x193), region = 24  ;;  %s417_s26 = sshll.u32 (!%p110_p10), %s130_s25, 2 }
  0x10   : > { %s421_s27 = sshll.u32 (!%p110_p10), %s655_s9, 6  ;;  %s132_s28 = scalar_lea.vmem (!%p110_p10), [#allocation3], %s417_s26 }
  0x11   : > { %s339_s29 = sshll.u32 (!%p110_p10), %s132_s28, 4  ;;  %s778_s3 = scalar_lea.hbm (!%p110_p10), %s827_s1, %s421_s27  ;;  %s780_s29 = int_to_ptr.vmem [resolvable:$true] %s339_s29 }
  0x12   : > { %s326_s4 = scalar_lea.sflag (!%p110_p10), [#allocation4], %s130_s25  ;;  %s585_s5 = scalar_lea.vmem (!%p110_p10), %s780_s29, 64 }
  0x13   : > { %p586_p12 = scmp.ne.s32.totalorder (!%p110_p10), %s780_s29, %s585_s5 }
  0x15   : > { %p587_p13 = pnand (!%p110_p10), %p586_p12, %p717_p4 }
  0x16   : > { %s135_s20 = scalar_select %p134_p11, %s655_s9, 1 }
  0x17   : > { %p588_p0 = pneg %p587_p13  ;;  %s666_s9 = smov [#allocation3]  }
  0x18   : > { %s424_s21 = sshll.u32 %s135_s20, 8  ;;  %s589_s12 = sshll.u32 %s666_s9, 4  ;;  %s590_s12 = int_to_ptr.vmem [resolvable:$false] %s589_s12 }
  0x19   : > { %s737_s24 = scalar_lea.vmem %s826_s0, %s424_s21  ;;  %s591_s13 = scalar_lea.vmem %s590_s12, 128 }
  0x1a   : > { %v149_v0 = vld [vmem:[%s737_s24] sm:$0xff]  ;;  %v150_v2 = vld [vmem:[%s737_s24 + $0x8] sm:$0xff]  ;;  %v167_v6 = vld [vmem:[%s737_s24 + $0x90] sm:$0xff]  ;;  %p592_p1 = scmp.lt.s32.totalorder %s780_s29, %s590_s12  ;;  %p593_p2 = scmp.lt.s32.totalorder %s591_s13, %s585_s5 }
  0x1b   : > { %v165_v1 = vld [vmem:[%s737_s24 + $0x80] sm:$0xff]  ;;  %v166_v4 = vld [vmem:[%s737_s24 + $0x88] sm:$0xff]  ;;  %v462_v5 = vpack.c.bf16 %v150_v2, %v149_v0  ;;  %v168_v7 = vld [vmem:[%s737_s24 + $0x98] sm:$0xff] }
  0x1c   : > { %v548_v3 = vpack.i.bf16 %v149_v0, %v165_v1  ;;  %v460_v8 = vpack.c.bf16 %v166_v4, %v165_v1  ;;  %v550_v9 = vpack.i.bf16 %v150_v2, %v166_v4  ;;  %v464_v10 = vpack.c.bf16 %v168_v7, %v167_v6  ;;  %v151_v11 = vld [vmem:[%s737_s24 + $0x10] sm:$0xff]  ;;  %v152_v12 = vld [vmem:[%s737_s24 + $0x18] sm:$0xff]  ;;  %v169_v14 = vld [vmem:[%s737_s24 + $0xa0] sm:$0xff]  ;;  %p594_p3 = por %p593_p2, %p592_p1 }
  0x1d   : > { %v466_v13 = vpack.c.bf16 %v152_v12, %v151_v11  ;;  %v170_v15 = vld [vmem:[%s737_s24 + $0xa8] sm:$0xff]  ;;  %v552_v17 = vpack.i.bf16 %v151_v11, %v167_v6  ;;  %v153_v18 = vld [vmem:[%s737_s24 + $0x20] sm:$0xff]  ;;  %v171_v21 = vld [vmem:[%s737_s24 + $0xb0] sm:$0xff]  ;;  %v554_v24 = vpack.i.bf16 %v152_v12, %v168_v7 }
  0x1e   : > { %549 = vxpose.xlu0.b32.start [1/16] (narrow) %v548_v3, 8  ;;  %461 = vmatprep.subr.bf16.mxu0 %v460_v8  ;;  %v468_v16 = vpack.c.bf16 %v170_v15, %v169_v14  ;;  %v154_v19 = vld [vmem:[%s737_s24 + $0x28] sm:$0xff]  ;;  %v172_v22 = vld [vmem:[%s737_s24 + $0xb8] sm:$0xff]  ;;  %v155_v25 = vld [vmem:[%s737_s24 + $0x30] sm:$0xff]  ;;  %v556_v31 = vpack.i.bf16 %v153_v18, %v169_v14  ;;  %v665_v3 = vmov 0.0   ;;  %p595_p5 = pnand %p594_p3, %p588_p0 }
  0x1f   : > { %463 = vmatpush3.bf16.msra.mxu0 %v462_v5  ;;  %v470_v20 = vpack.c.bf16 %v154_v19, %v153_v18  ;;  %v472_v23 = vpack.c.bf16 %v172_v22, %v171_v21  ;;  %v156_v26 = vld [vmem:[%s737_s24 + $0x38] sm:$0xff]  ;;  %v173_v28 = vld [vmem:[%s737_s24 + $0xc0] sm:$0xff]  ;;  %v174_v29 = vld [vmem:[%s737_s24 + $0xc8] sm:$0xff]  ;;  %v558_v38 = vpack.i.bf16 %v154_v19, %v170_v15  ;;  %v560_v45 = vpack.i.bf16 %v155_v25, %v171_v21 }
  0x20   : > { %465 = vmatprep.subr.bf16.mxu0 %v464_v10  ;;  %v474_v27 = vpack.c.bf16 %v156_v26, %v155_v25  ;;  %v476_v30 = vpack.c.bf16 %v174_v29, %v173_v28  ;;  %v157_v32 = vld [vmem:[%s737_s24 + $0x40] sm:$0xff]  ;;  %v158_v33 = vld [vmem:[%s737_s24 + $0x48] sm:$0xff]  ;;  %v175_v35 = vld [vmem:[%s737_s24 + $0xd0] sm:$0xff]  ;;  %v562_v52 = vpack.i.bf16 %v156_v26, %v172_v22  ;;  %148 = vst.msk [vmem:[#allocation2] sm:$0xf] %vm147_vm0, %v665_v3 }
  0x21   : > { %v478_v34 = vpack.c.bf16 %v158_v33, %v157_v32  ;;  %v176_v36 = vld [vmem:[%s737_s24 + $0xd8] sm:$0xff]  ;;  %v159_v39 = vld [vmem:[%s737_s24 + $0x50] sm:$0xff]  ;;  %v177_v42 = vld [vmem:[%s737_s24 + $0xe0] sm:$0xff]  ;;  %v564_v56 = vpack.i.bf16 %v157_v32, %v173_v28  ;;  %v566_v57 = vpack.i.bf16 %v158_v33, %v174_v29 }
  0x22   : > { %551 = vxpose.xlu0.b32.cont [2/16] (narrow) %v550_v9, 8  ;;  %v480_v37 = vpack.c.bf16 %v176_v36, %v175_v35  ;;  %v160_v40 = vld [vmem:[%s737_s24 + $0x58] sm:$0xff]  ;;  %v178_v43 = vld [vmem:[%s737_s24 + $0xe8] sm:$0xff]  ;;  %v161_v46 = vld [vmem:[%s737_s24 + $0x60] sm:$0xff]  ;;  %v568_v58 = vpack.i.bf16 %v159_v39, %v175_v35 }
  0x23   : > { %467 = vmatpush3.bf16.msra.mxu0 %v466_v13  ;;  %v482_v41 = vpack.c.bf16 %v160_v40, %v159_v39  ;;  %v484_v44 = vpack.c.bf16 %v178_v43, %v177_v42  ;;  %v162_v47 = vld [vmem:[%s737_s24 + $0x68] sm:$0xff]  ;;  %v179_v49 = vld [vmem:[%s737_s24 + $0xf0] sm:$0xff]  ;;  %v180_v50 = vld [vmem:[%s737_s24 + $0xf8] sm:$0xff]  ;;  %v570_v59 = vpack.i.bf16 %v160_v40, %v176_v36  ;;  %v572_v60 = vpack.i.bf16 %v161_v46, %v177_v42 }
  0x24   : > { %469 = vmatprep.subr.bf16.mxu0 %v468_v16  ;;  %v486_v48 = vpack.c.bf16 %v162_v47, %v161_v46  ;;  %v488_v51 = vpack.c.bf16 %v180_v50, %v179_v49  ;;  %v163_v53 = vld [vmem:[%s737_s24 + $0x70] sm:$0xff]  ;;  %v164_v54 = vld [vmem:[%s737_s24 + $0x78] sm:$0xff]  ;;  %v574_v61 = vpack.i.bf16 %v162_v47, %v178_v43 }
  0x25   : > { %v490_v55 = vpack.c.bf16 %v164_v54, %v163_v53  ;;  %v576_v62 = vpack.i.bf16 %v163_v53, %v179_v49  ;;  %v578_v63 = vpack.i.bf16 %v164_v54, %v180_v50 }
  0x26   : > { %553 = vxpose.xlu0.b32.cont [3/16] (narrow) %v552_v17, 8 }
  0x27   : > { %471 = vmatpush3.bf16.msra.mxu0 %v470_v20  ;;  %v181_v5 = vld [vmem:[#allocation2] sm:$0xf] }
  0x28   : > { %473 = vmatprep.subr.bf16.mxu0 %v472_v23 }
  0x2a   : > { %555 = vxpose.xlu0.b32.cont [4/16] (narrow) %v554_v24, 8 }
  0x2b   : > { %475 = vmatpush3.bf16.msra.mxu0 %v474_v27 }
  0x2c   : > { %477 = vmatprep.subr.bf16.mxu0 %v476_v30 }
  0x2e   : > { %557 = vxpose.xlu0.b32.cont [5/16] (narrow) %v556_v31, 8 }
  0x2f   : > { %479 = vmatpush3.bf16.msra.mxu0 %v478_v34 }
  0x30   : > { %481 = vmatprep.subr.bf16.mxu0 %v480_v37 }
  0x32   : > { %559 = vxpose.xlu0.b32.cont [6/16] (narrow) %v558_v38, 8 }
  0x33   : > { %483 = vmatpush3.bf16.msra.mxu0 %v482_v41 }
  0x34   : > { %485 = vmatprep.subr.bf16.mxu0 %v484_v44 }
  0x36   : > { %561 = vxpose.xlu0.b32.cont [7/16] (narrow) %v560_v45, 8 }
  0x37   : > { %487 = vmatpush3.bf16.msra.mxu0 %v486_v48 }
  0x38   : > { %489 = vmatprep.subr.bf16.mxu0 %v488_v51 }
  0x3a   : > { %563 = vxpose.xlu0.b32.cont [8/16] (narrow) %v562_v52, 8 }
  0x3b   : > { %491 = vmatpush3.bf16.msra.mxu0 %v490_v55 }
  0x3e   : > { %565 = vxpose.xlu0.b32.cont [9/16] (narrow) %v564_v56, 8 }
  0x42   : > { %567 = vxpose.xlu0.b32.cont [10/16] (narrow) %v566_v57, 8 }
  0x46   : > { %569 = vxpose.xlu0.b32.cont [11/16] (narrow) %v568_v58, 8 }
  0x4a   : > { %571 = vxpose.xlu0.b32.cont [12/16] (narrow) %v570_v59, 8 }
  0x4e   : > { %573 = vxpose.xlu0.b32.cont [13/16] (narrow) %v572_v60, 8 }
  0x52   : > { %575 = vxpose.xlu0.b32.cont [14/16] (narrow) %v574_v61, 8 }
  0x56   : > { %577 = vxpose.xlu0.b32.cont [15/16] (narrow) %v576_v62, 8 }
  0x5a   : > { %579 = vxpose.xlu0.b32.end [16/16] (narrow) %v578_v63, 8 }
  0x9e   : > { %v580_v0 = vpop.trf.xlu0 }
  0x9f   : > { %v584_v1 = vunpack.i.h.bf16 %v580_v0  ;;  %v581_v2 = vunpack.i.l.bf16 %v580_v0 }
  0xa1   : > { %310 = vmatprep.mubr.f32.mxu0 %v581_v2 }
  0xa2   : > { %311 = vmatmul.mubr.f32.vlgmr.msra.gmra.mrb[0].mxu0 %v584_v1 }
 0x175   : > { %v457_v4 = vpop.f32.mrb[0].mxu0 }
 0x176   : > { %v458_v6 = vpop.f32.mrb[1].mxu0 }
 0x177   : > { %v459_v7 = vadd.f32 %v458_v6, %v457_v4 }
 0x179   : > { %v316_v8 = vadd.f32 %v459_v7, %v181_v5 }
 0x17b   : > { %318 = vst.msk [vmem:[#allocation2] sm:$0xf] %vm147_vm0, %v316_v8 }
 0x182   : > { %v322_v9 = vld [vmem:[#allocation2] sm:$0xf] }
 0x183   : > { %v323_v10 = vmul.f32 0.0009765625, %v322_v9 }
 0x185   : > { %324 = vst.msk [vmem:[%s132_s28] sm:$0xf] %vm147_vm0, %v323_v10 }
 0x186   : > { %598 = shalt.err (!%p595_p5)
}
 0x187   : > { %s599_s15 = scalar_lea.hbm %s778_s3, 64  ;;  %s603_s21 = scalar_lea.hbm %s827_s1, 128 }
 0x188   : > { %p600_p6 = scmp.ne.s32.totalorder %s778_s3, %s599_s15  ;;  %p604_p10 = scmp.lt.u32.totalorder %s778_s3, %s827_s1 }
 0x189   : > { %p605_p11 = scmp.lt.u32.totalorder %s603_s21, %s599_s15  ;;  %p607_p13 = scmp.lt.u32.totalorder %s599_s15, %s778_s3 }
 0x18a   : > { %p601_p7 = pnand %p600_p6, %p717_p4 }
 0x18b   : > { %p606_p12 = por %p605_p11, %p604_p10 }
 0x18c   : > { %p602_p9 = pneg %p601_p7 }
 0x18d   : > { %p608_p0 = por %p607_p13, %p606_p12 }
 0x18f   : > { %p609_p1 = pnand %p608_p0, %p602_p9 }
 0x191   : > { %612 = shalt.err (!%p609_p1)
}
 0x192   : > { %492 = dma.vmem_to_hbm [thread:$0]  (%p717_p4), %s780_s29, 64, %s778_s3, %s326_s4  }
 0x193 PF: > { %p498_p2 = scmp.ge.s32.totalorder %s663_s11, 2  ;;  %s351_s24 = sand.u32 1, %s643_s6  }
 0x194   : > { %s352_s25 = scalar_lea.sflag [#allocation4], %s351_s24 }
 0x195   : > { %p495_p3 = pnand %p498_p2, %p724_p8 }
 0x197   : > { %638 = dma.done.wait (!%p495_p3), %s352_s25, 64  }
 0x198   : > { %640 = vsyncadd (!%p495_p3), %s352_s25, 4294967232  ;;  %s14_s11 = sadd.s32 1, %s663_s11   ;;  %s830_s6 = smov %s647_s7 }
 0x199   : > { %p11_p5 = scmp.ge.s32.totalorder %s14_s11, 4   ;;  %s831_s7 = smov %s651_s8 }
 0x19a   : > { %s832_s8 = smov %s730_s19  ;;  %s833_s9 = smov %s659_s10 }
 0x19b   : > { %s834_s10 = smov %s836_s14  ;;  %13 = sbr.rel (!%p11_p5) target bundleno = 4 (0x4), region = 67 }
 0x1a2   :  { %357 = vsyncpa [#allocation4], 1 }
 0x1a3   :  { %359 = vsyncpa [#allocation4 + $0x1], 1 }

</bundles_post_ra>
